<compile_context>
chip_gen: v6e
topology: v6e:2x2x1
jax: 0.10.0
libtpu: 0.0.40
codegen_flags: <defaults>
</compile_context>

<pallas_src>
import functools

import jax
import jax.numpy as jnp
from jax import lax
from jax.experimental import pallas as pl
from jax.experimental.pallas import tpu as pltpu


def head_kernel(x_ref, wk_ref, wq_ref, wv_ref, o_ref, *, compute_dtype):
    # x_ref: (Bb, T, C); wk/wq/wv: (C, HP) with HP a multiple of 128 (zero
    # padded); o_ref: (Bb, T, HP). The *C**0.5 scale is already folded into Wq.
    Bb, T, C = x_ref.shape
    HP = wk_ref.shape[1]

    # Flatten the batch block into the MXU M dimension: one (Bb*T, C) matmul
    # per projection instead of Bb tiny (T, C) ones.
    x2 = x_ref[...].reshape(Bb * T, C).astype(compute_dtype)
    wk = wk_ref[...].astype(compute_dtype)
    wq = wq_ref[...].astype(compute_dtype)
    wv = wv_ref[...].astype(compute_dtype)

    k = jnp.dot(x2, wk, preferred_element_type=jnp.float32).reshape(Bb, T, HP)
    q = jnp.dot(x2, wq, preferred_element_type=jnp.float32).reshape(Bb, T, HP)
    v = jnp.dot(x2, wv, preferred_element_type=jnp.float32).reshape(Bb, T, HP)

    # Attention logits: batched contraction on the last dim of both operands
    # (no materialized k.T / XLU transpose). Scale already applied via Wq.
    wei = lax.dot_general(
        q.astype(compute_dtype), k.astype(compute_dtype),
        dimension_numbers=(((2,), (2,)), ((0,), (0,))),
        preferred_element_type=jnp.float32)                    # (Bb, T, T)

    # Causal (lower-triangular) mask. -inf is safe: every causal row has at
    # least one unmasked entry (the diagonal), exactly as in the reference.
    row = lax.broadcasted_iota(jnp.int32, (T, T), 0)
    col = lax.broadcasted_iota(jnp.int32, (T, T), 1)
    wei = jnp.where((col <= row)[None, :, :], wei, -jnp.inf)

    # Numerically stable softmax, kept in f32 (v5e VPU/EUP have no bf16).
    wei = wei - jnp.max(wei, axis=-1, keepdims=True)
    p = jnp.exp(wei)
    p = p * pl.reciprocal(jnp.sum(p, axis=-1, keepdims=True), approx=True)

    # Dropout is identity in eval mode.

    out = lax.dot_general(
        p.astype(compute_dtype), v.astype(compute_dtype),
        dimension_numbers=(((2,), (1,)), ((0,), (0,))),
        preferred_element_type=jnp.float32)                    # (Bb, T, HP)
    o_ref[...] = out.astype(o_ref.dtype)


def head_forward(x, wk, wq, wv, *, compute_dtype=jnp.float32, block_b=None):
    """x: (B, T, C); wk/wq/wv: (C, H) -> out: (B, T, H)."""
    B, T, C = x.shape
    H = wk.shape[1]
    scale = float(C) ** 0.5  # faithful to the module: multiply by C**0.5

    # Fold the scale into Wq once (O(C*H)) instead of scaling (T, T) logits.
    wq = wq * jnp.asarray(scale, wq.dtype)

    # Pad the head dim up to a lane-dense multiple of 128 so output stores are
    # full-lane; the padded columns are exact zeros and are sliced off below.
    HP = ((H + 127) // 128) * 128
    pad = HP - H
    if pad:
        wk = jnp.pad(wk, ((0, 0), (0, pad)))
        wq = jnp.pad(wq, ((0, 0), (0, pad)))
        wv = jnp.pad(wv, ((0, 0), (0, pad)))

    # Pack several batch rows per grid step (~128-256 MXU rows) to amortize
    # the ~0.35 us per-step pipeline overhead. Must divide B evenly.
    if block_b is None:
        block_b = max(1, min(B, max(1, 256 // T)))
    while B % block_b:
        block_b -= 1
    grid = (B // block_b,)

    kernel = functools.partial(head_kernel, compute_dtype=compute_dtype)

    out = pl.pallas_call(
        kernel,
        out_shape=jax.ShapeDtypeStruct((B, T, HP), x.dtype),
        grid_spec=pltpu.PrefetchScalarGridSpec(
            num_scalar_prefetch=0,
            grid=grid,
            in_specs=[
                # x: one block of batch rows per grid step (streamed).
                pl.BlockSpec((block_b, T, C), lambda b: (b, 0, 0)),
                # Weights: constant block index -> resident, not re-DMA'd.
                pl.BlockSpec((C, HP), lambda b: (0, 0)),
                pl.BlockSpec((C, HP), lambda b: (0, 0)),
                pl.BlockSpec((C, HP), lambda b: (0, 0)),
            ],
            out_specs=pl.BlockSpec((block_b, T, HP), lambda b: (b, 0, 0)),
        ),
        compiler_params=pltpu.CompilerParams(
            dimension_semantics=("parallel",),
        ),
    )(x, wk, wq, wv)

    return out[..., :H]


def head_reference(x, wk, wq, wv):
    """Pure-JAX reference matching the PyTorch forward (eval mode)."""
    B, T, C = x.shape
    k = x @ wk
    q = x @ wq
    v = x @ wv
    wei = jnp.einsum("btd,bsd->bts", q, k) * (float(C) ** 0.5)
    tril = jnp.tril(jnp.ones((T, T), dtype=bool))
    wei = jnp.where(tril, wei, -jnp.inf)
    wei = jax.nn.softmax(wei, axis=-1)
    return wei @ v


if __name__ == "__main__":
    # Shapes implied by the module: B=2, block_size=T=8, C1=32, head_size=16
    B, T, C1, head_size = 2, 8, 32, 16

    key = jax.random.PRNGKey(0)
    kx, kk, kq, kv = jax.random.split(key, 4)
    x = jax.random.normal(kx, (B, T, C1), dtype=jnp.float32)
    # PyTorch Linear weight (H, C1) stored transposed as (C1, H).
    wk = jax.random.normal(kk, (C1, head_size), dtype=jnp.float32) * (C1 ** -0.5)
    wq = jax.random.normal(kq, (C1, head_size), dtype=jnp.float32) * (C1 ** -0.5)
    wv = jax.random.normal(kv, (C1, head_size), dtype=jnp.float32) * (C1 ** -0.5)

    out = head_forward(x, wk, wq, wv)
    out = jax.block_until_ready(out)

    ref = head_reference(x, wk, wq, wv)
    assert out.shape == (B, T, head_size)
    # Tolerance accounts for the approximate (EUP) reciprocal in the softmax.
    assert jnp.allclose(out, ref, atol=1e-2, rtol=1e-2), "mismatch vs reference"

    print("KERNEL_OK")
</pallas_src>

<mosaic_0001>
module attributes {stable_mosaic.version = 11 : i64} {
  func.func @head_kernel(%arg0: i32, %arg1: memref<2x8x32xf32, #tpu.memory_space<vmem>>, %arg2: memref<32x128xf32, #tpu.memory_space<vmem>>, %arg3: memref<32x128xf32, #tpu.memory_space<vmem>>, %arg4: memref<32x128xf32, #tpu.memory_space<vmem>>, %arg5: memref<2x8x128xf32, #tpu.memory_space<vmem>>) attributes {dimension_semantics = [#tpu.dimension_semantics<parallel>], iteration_bounds = array<i64: 1>, scalar_prefetch = 0 : i64, scratch_operands = 0 : i64, tpu.core_type = #tpu.core_type<tc>, window_params = [{transform_indices = @transform_0, window_bounds = array<i64: 2, 8, 32>}, {pipeline_mode = #tpu.pipeline_mode<synchronous>, transform_indices = @transform_1, window_bounds = array<i64: 32, 128>}, {pipeline_mode = #tpu.pipeline_mode<synchronous>, transform_indices = @transform_2, window_bounds = array<i64: 32, 128>}, {pipeline_mode = #tpu.pipeline_mode<synchronous>, transform_indices = @transform_3, window_bounds = array<i64: 32, 128>}, {transform_indices = @transform_4, window_bounds = array<i64: 2, 8, 128>}]} {
    %c0 = arith.constant 0 : index
    %c0_0 = arith.constant 0 : index
    %c0_1 = arith.constant 0 : index
    %0 = vector.load %arg1[%c0, %c0_0, %c0_1] : memref<2x8x32xf32, #tpu.memory_space<vmem>>, vector<2x8x32xf32>
    %1 = vector.shape_cast %0 : vector<2x8x32xf32> to vector<16x32xf32>
    %c0_2 = arith.constant 0 : index
    %c0_3 = arith.constant 0 : index
    %2 = vector.load %arg2[%c0_2, %c0_3] : memref<32x128xf32, #tpu.memory_space<vmem>>, vector<32x128xf32>
    %c0_4 = arith.constant 0 : index
    %c0_5 = arith.constant 0 : index
    %3 = vector.load %arg3[%c0_4, %c0_5] : memref<32x128xf32, #tpu.memory_space<vmem>>, vector<32x128xf32>
    %c0_6 = arith.constant 0 : index
    %c0_7 = arith.constant 0 : index
    %4 = vector.load %arg4[%c0_6, %c0_7] : memref<32x128xf32, #tpu.memory_space<vmem>>, vector<32x128xf32>
    %cst = arith.constant dense<0.000000e+00> : vector<16x128xf32>
    %5 = tpu.matmul %1, %2, %cst {dimension_numbers = #tpu.dot_dimension_numbers<[1], [0], [0], [1], [0, 0, 1, 1], [], []>} : vector<16x32xf32>, vector<32x128xf32>, vector<16x128xf32> -> vector<16x128xf32>
    %6 = vector.shape_cast %5 : vector<16x128xf32> to vector<2x8x128xf32>
    %cst_8 = arith.constant dense<0.000000e+00> : vector<16x128xf32>
    %7 = tpu.matmul %1, %3, %cst_8 {dimension_numbers = #tpu.dot_dimension_numbers<[1], [0], [0], [1], [0, 0, 1, 1], [], []>} : vector<16x32xf32>, vector<32x128xf32>, vector<16x128xf32> -> vector<16x128xf32>
    %8 = vector.shape_cast %7 : vector<16x128xf32> to vector<2x8x128xf32>
    %cst_9 = arith.constant dense<0.000000e+00> : vector<16x128xf32>
    %9 = tpu.matmul %1, %4, %cst_9 {dimension_numbers = #tpu.dot_dimension_numbers<[1], [0], [0], [1], [0, 0, 1, 1], [], []>} : vector<16x32xf32>, vector<32x128xf32>, vector<16x128xf32> -> vector<16x128xf32>
    %10 = vector.shape_cast %9 : vector<16x128xf32> to vector<2x8x128xf32>
    %cst_10 = arith.constant dense<0.000000e+00> : vector<2x8x8xf32>
    %11 = tpu.matmul %8, %6, %cst_10 {dimension_numbers = #tpu.dot_dimension_numbers<[2], [2], [1], [1], [0, 0, 0, 1, 1, 1], [0], [0]>} : vector<2x8x128xf32>, vector<2x8x128xf32>, vector<2x8x8xf32> -> vector<2x8x8xf32>
    %12 = tpu.iota {dimensions = array<i32: 0>} : vector<8x8xi32>
    %13 = tpu.iota {dimensions = array<i32: 1>} : vector<8x8xi32>
    %14 = arith.cmpi sle, %13, %12 : vector<8x8xi32>
    %15 = vector.shape_cast %14 : vector<8x8xi1> to vector<1x8x8xi1>
    %cst_11 = arith.constant 0xFF800000 : f32
    %16 = vector.shape_cast %15 : vector<1x8x8xi1> to vector<1x8x8xi1>
    %17 = vector.broadcast %16 : vector<1x8x8xi1> to vector<2x8x8xi1>
    %18 = vector.broadcast %cst_11 : f32 to vector<2x8x8xf32>
    %19 = arith.select %17, %11, %18 : vector<2x8x8xi1>, vector<2x8x8xf32>
    %cst_12 = arith.constant dense<0xFF800000> : vector<2x8xf32>
    %20 = vector.multi_reduction <maximumf>, %19, %cst_12 [2] : vector<2x8x8xf32> to vector<2x8xf32>
    %21 = vector.shape_cast %20 : vector<2x8xf32> to vector<2x8x1xf32>
    %22 = vector.broadcast %21 : vector<2x8x1xf32> to vector<2x8x8xf32>
    %23 = arith.subf %19, %22 : vector<2x8x8xf32>
    %24 = math.exp %23 : vector<2x8x8xf32>
    %cst_13 = arith.constant dense<0.000000e+00> : vector<2x8xf32>
    %25 = vector.multi_reduction <add>, %24, %cst_13 [2] : vector<2x8x8xf32> to vector<2x8xf32>
    %26 = vector.shape_cast %25 : vector<2x8xf32> to vector<2x8x1xf32>
    %27 = tpu.reciprocal %26 {approx = true} : vector<2x8x1xf32> -> vector<2x8x1xf32>
    %28 = vector.broadcast %27 : vector<2x8x1xf32> to vector<2x8x8xf32>
    %29 = arith.mulf %24, %28 : vector<2x8x8xf32>
    %cst_14 = arith.constant dense<0.000000e+00> : vector<2x8x128xf32>
    %30 = tpu.matmul %29, %10, %cst_14 {dimension_numbers = #tpu.dot_dimension_numbers<[2], [1], [1], [2], [0, 0, 0, 1, 1, 2], [0], [0]>} : vector<2x8x8xf32>, vector<2x8x128xf32>, vector<2x8x128xf32> -> vector<2x8x128xf32>
    %c0_15 = arith.constant 0 : index
    %c0_16 = arith.constant 0 : index
    %c0_17 = arith.constant 0 : index
    %31 = vector.load %arg5[%c0_15, %c0_16, %c0_17] : memref<2x8x128xf32, #tpu.memory_space<vmem>>, vector<2x8x128xf32>
    tpu.vector_store %arg5[%c0_15, %c0_16, %c0_17], %30 {strides = array<i32>} : memref<2x8x128xf32, #tpu.memory_space<vmem>>, vector<2x8x128xf32>,
    return
  }
  func.func @transform_0(%arg0: i32) -> (i32, i32, i32) {
    %c0_i32 = arith.constant 0 : i32
    %c0_i32_0 = arith.constant 0 : i32
    %c0_i32_1 = arith.constant 0 : i32
    return %arg0, %c0_i32, %c0_i32_0 : i32, i32, i32
  }
  func.func @transform_1(%arg0: i32) -> (i32, i32) {
    %c0_i32 = arith.constant 0 : i32
    %c0_i32_0 = arith.constant 0 : i32
    %c0_i32_1 = arith.constant 0 : i32
    return %c0_i32, %c0_i32_0 : i32, i32
  }
  func.func @transform_2(%arg0: i32) -> (i32, i32) {
    %c0_i32 = arith.constant 0 : i32
    %c0_i32_0 = arith.constant 0 : i32
    %c0_i32_1 = arith.constant 0 : i32
    return %c0_i32, %c0_i32_0 : i32, i32
  }
  func.func @transform_3(%arg0: i32) -> (i32, i32) {
    %c0_i32 = arith.constant 0 : i32
    %c0_i32_0 = arith.constant 0 : i32
    %c0_i32_1 = arith.constant 0 : i32
    return %c0_i32, %c0_i32_0 : i32, i32
  }
  func.func @transform_4(%arg0: i32) -> (i32, i32, i32) {
    %c0_i32 = arith.constant 0 : i32
    %c0_i32_0 = arith.constant 0 : i32
    %c0_i32_1 = arith.constant 0 : i32
    return %arg0, %c0_i32, %c0_i32_0 : i32, i32, i32
  }
}

</mosaic_0001>

<bundles_post_ra>
// kernel: tpu_custom_call.1
= control target key start
LH: loop header
LB: loop body
LE: loop exit
PB: predicated region body
PF: predicated region fallthrough
CT: control target
= control target key end

     0   :  { %9 = vsyncpa [#allocation3], 0  ;;  %s950_s0 = inlined_call_operand.hbm [shape: f32[2,8,32], index: 0, kind: input, shape index: {}]   ;;  %s951_s1 = inlined_call_operand.hbm [shape: f32[32,128], index: 1, kind: input, shape index: {}]   ;;  %s952_s2 = inlined_call_operand.hbm [shape: f32[32,128], index: 2, kind: input, shape index: {}]   ;;  %s953_s3 = inlined_call_operand.hbm [shape: f32[32,128], index: 3, kind: input, shape index: {}]   ;;  %s954_s4 = inlined_call_operand.hbm [shape: f32[2,8,128], index: 4, kind: output, shape index: {}]  }
   0x1   :  { %10 = vsyncpa [#allocation6], 0 }
   0x2   :  { %11 = vsyncpa [#allocation9], 0 }
   0x3   :  { %12 = vsyncpa [#allocation4], 0  ;;  %s870_s15 = smov [#allocation5]   ;;  %s871_s17 = smov [#allocation2]  }
   0x4   :  { %s30_s16 = sshll.u32 %s870_s15, 4  ;;  %s18_s18 = sshll.u32 %s871_s17, 4  ;;  %s31_s16 = int_to_ptr.vmem [resolvable:$true] %s30_s16  ;;  %s19_s18 = int_to_ptr.vmem [resolvable:$true] %s18_s18 }
   0x5   :  { %s770_s19 = scalar_lea.vmem %s31_s16, 512  ;;  %p775_p1 = scmp.lt.s32.totalorder %s31_s16, %s31_s16 }
   0x6   :  { %p771_p0 = scmp.ne.s32.totalorder %s31_s16, %s770_s19  ;;  %p776_p2 = scmp.lt.s32.totalorder %s770_s19, %s770_s19 }
   0x8   :  { %p777_p3 = por %p776_p2, %p775_p1 }
   0xa   :  { %p778_p4 = pnand %p777_p3, %p771_p0 }
   0xc   :  { %781 = shalt.err (!%p778_p4)
}
   0xd   :  { %s872_s20 = smov 128   ;;  %s873_s21 = smov 8  }
   0xe   :  { %36 = dma.hbm_to_vmem [thread:$0]  %s951_s1, 512, %s31_s16, [#allocation6], %s872_s20, %s872_s20, %s873_s21  }
   0xf   :  { %s790_s24 = scalar_lea.vmem %s19_s18, 256  ;;  %p795_p6 = scmp.lt.s32.totalorder %s19_s18, %s19_s18 }
  0x10   :  { %p791_p5 = scmp.ne.s32.totalorder %s19_s18, %s790_s24  ;;  %p796_p7 = scmp.lt.s32.totalorder %s790_s24, %s790_s24 }
  0x12   :  { %p797_p8 = por %p796_p7, %p795_p6 }
  0x14   :  { %p798_p9 = pnand %p797_p8, %p791_p5 }
  0x16   :  { %801 = shalt.err (!%p798_p9)
}
  0x17   :  { %24 = dma.hbm_to_vmem [thread:$0]  %s950_s0, 256, %s19_s18, [#allocation3], %s872_s20, %s872_s20, %s873_s21  }
  0x18   :  { %s874_s27 = smov [#allocation7]   ;;  %s875_s29 = smov [#allocation8]  }
  0x19   :  { %s42_s28 = sshll.u32 %s874_s27, 4  ;;  %s54_s30 = sshll.u32 %s875_s29, 4  ;;  %s43_s28 = int_to_ptr.vmem [resolvable:$true] %s42_s28  ;;  %s55_s30 = int_to_ptr.vmem [resolvable:$true] %s54_s30 }
  0x1a   :  { %s810_s1 = scalar_lea.vmem %s43_s28, 512  ;;  %p815_p11 = scmp.lt.s32.totalorder %s43_s28, %s43_s28 }
  0x1b   :  { %p811_p10 = scmp.ne.s32.totalorder %s43_s28, %s810_s1  ;;  %p816_p12 = scmp.lt.s32.totalorder %s810_s1, %s810_s1 }
  0x1d   :  { %p817_p13 = por %p816_p12, %p815_p11 }
  0x1f   :  { %p818_p0 = pnand %p817_p13, %p811_p10 }
  0x21   :  { %821 = shalt.err (!%p818_p0)
}
  0x22   :  { %48 = dma.hbm_to_vmem [thread:$0]  %s952_s2, 512, %s43_s28, [#allocation6], %s872_s20, %s872_s20, %s873_s21  }
  0x23   :  { %s830_s0 = scalar_lea.vmem %s55_s30, 512  ;;  %p835_p2 = scmp.lt.s32.totalorder %s55_s30, %s55_s30 }
  0x24   :  { %p831_p1 = scmp.ne.s32.totalorder %s55_s30, %s830_s0  ;;  %p836_p3 = scmp.lt.s32.totalorder %s830_s0, %s830_s0 }
  0x26   :  { %p837_p4 = por %p836_p3, %p835_p2 }
  0x28   :  { %p838_p5 = pnand %p837_p4, %p831_p1 }
  0x2a   :  { %841 = shalt.err (!%p838_p5)
}
  0x2b   :  { %60 = dma.hbm_to_vmem [thread:$0]  %s953_s3, 512, %s55_s30, [#allocation9], %s872_s20, %s872_s20, %s873_s21  }
  0x2c   :  { %862 = dma.done.wait [#allocation3], 256  }
  0x2d   :  { %863 = vsyncadd [#allocation3], 4294967040 }
  0x2e   :  { %864 = dma.done.wait [#allocation6], 1024  }
  0x2f   :  { %865 = vsyncadd [#allocation6], 4294966272 }
  0x30   :  { %866 = dma.done.wait [#allocation9], 512  }
  0x31   :  { %867 = vsyncadd [#allocation9], 4294966784  ;;  %v78_v0 = vld [vmem:[#allocation5 + $0x18] sm:$0xff]  ;;  %v77_v1 = vld [vmem:[#allocation5 + $0x10] sm:$0xff]  ;;  %vm87_vm0 = vcmask 261120   ;;  %v876_v10 = vmov 0.0   ;;  %v459_v19 = vlaneseq }
  0x32   :  { %v82_v2 = vld [vmem:[#allocation7 + $0x18] sm:$0xff]  ;;  %692 = vmatprep.subr.mxu0 %v78_v0  ;;  %v81_v3 = vld [vmem:[#allocation7 + $0x10] sm:$0xff]  ;;  %v76_v4 = vld [vmem:[#allocation5 + $0x8] sm:$0xff]  ;;  %vm877_vm1 = vmmov 0   ;;  %vm468_vm3 = vcmask 64512   ;;  %s878_s2 = smov [#allocation10]  }
  0x33   :  { %703 = vmatprep.subr.mxu1 %v82_v2  ;;  %693 = vmatpush3.msra.mxu0 %v78_v0  ;;  %v80_v5 = vld [vmem:[#allocation7 + $0x8] sm:$0xff]  ;;  %v73_v6 = vld [vmem:[#allocation2] sm:$0xff]  ;;  %v75_v7 = vld [vmem:[#allocation5] sm:$0xff]  ;;  %v460_v20 = vshrl.u32 %v459_v19, 7  ;;  %v462_v21 = vand.u32 127, %v459_v19  ;;  %s644_s3 = sshll.u32 %s878_s2, 4  ;;  %s645_s3 = int_to_ptr.vmem [resolvable:$true] %s644_s3 }
  0x34   :  { %704 = vmatpush3.msra.mxu1 %v82_v2  ;;  %694 = vmatprep.subr.mxu0 %v77_v1  ;;  %v79_v8 = vld [vmem:[#allocation7] sm:$0xff]  ;;  %v74_v9 = vld [vmem:[#allocation2 + $0x8] sm:$0xff]  ;;  %v85_v16 = vld [vmem:[#allocation8 + $0x10] sm:$0xff]  ;;  %s842_s9 = scalar_lea.vmem %s645_s3, 256  ;;  %p847_p7 = scmp.lt.s32.totalorder %s645_s3, %s645_s3 }
  0x35   :  { %705 = vmatprep.subr.mxu1 %v81_v3  ;;  %695 = vmatpush3.msra.mxu0 %v77_v1  ;;  %v86_v15 = vld [vmem:[#allocation8 + $0x18] sm:$0xff]  ;;  %v84_v17 = vld [vmem:[#allocation8 + $0x8] sm:$0xff]  ;;  %v83_v18 = vld [vmem:[#allocation8] sm:$0xff]  ;;  %vm463_vm2 = vcmp.le.s32.totalorder %v462_v21, %v460_v20  ;;  %p843_p6 = scmp.ne.s32.totalorder %s645_s3, %s842_s9  ;;  %p848_p8 = scmp.lt.s32.totalorder %s842_s9, %s842_s9 }
  0x36   :  { %706 = vmatpush3.msra.mxu1 %v81_v3  ;;  %696 = vmatprep.subr.mxu0 %v76_v4 }
  0x37   :  { %707 = vmatprep.subr.mxu1 %v80_v5  ;;  %697 = vmatpush3.msra.mxu0 %v76_v4  ;;  %p849_p9 = por %p848_p8, %p847_p7 }
  0x38   :  { %700 = vmatprep.mubr.msk.f32.mxu0 %vm87_vm0, %v73_v6  ;;  %698 = vmatprep.subr.mxu0 %v75_v7 }
  0x39   :  { %708 = vmatpush3.msra.mxu1 %v80_v5  ;;  %699 = vmatpush3.msra.mxu0 %v75_v7  ;;  %p850_p10 = pnand %p849_p9, %p843_p6 }
  0x3a   :  { %709 = vmatprep.subr.mxu1 %v79_v8  ;;  %701 = vmatmul.mubr.msk.f32.vlgmr.msra.gmra.mxu0 %vm87_vm0, %v74_v9 }
  0x3b   :  { %710 = vmatpush3.msra.mxu1 %v79_v8  ;;  %711 = vmatprep.mubr.msk.f32.mxu1 %vm87_vm0, %v73_v6 }
  0x3c   :  { %722 = vmatprep.mubr.msk.f32.mxu0 %vm87_vm0, %v73_v6  ;;  %712 = vmatmul.mubr.msk.f32.vlgmr.msra.gmra.mxu1 %vm87_vm0, %v74_v9 }
  0x3d   :  { %725 = vmatprep.subr.mxu1 %v876_v10  ;;  %727 = vmatprep.mubr.msk.f32.mxu1 %vm877_vm1, %v876_v10 }
  0x3e   :  { %714 = vmatprep.subr.mxu0 %v86_v15 }
  0x3f   :  { %715 = vmatpush3.msra.mxu0 %v86_v15 }
  0x40   :  { %716 = vmatprep.subr.mxu0 %v85_v16 }
  0x41   :  { %717 = vmatpush3.msra.mxu0 %v85_v16 }
  0x42   :  { %718 = vmatprep.subr.mxu0 %v84_v17 }
  0x43   :  { %719 = vmatpush3.msra.mxu0 %v84_v17 }
  0x44   :  { %720 = vmatprep.subr.mxu0 %v83_v18 }
  0x45   :  { %721 = vmatpush3.msra.mxu0 %v83_v18 }
  0x46   :  { %723 = vmatmul.mubr.msk.f32.vlgmr.msra.gmra.mxu0 %vm87_vm0, %v74_v9  ;;  %735 = vmatprep.subr.mxu0 %v876_v10 }
  0x47   :  { %737 = vmatprep.mubr.msk.f32.mxu0 %vm877_vm1, %v876_v10 }
  0xfa   :  { %v702_v11 = vpop.f32.mrf.mxu0 }
  0xfc   :  { %v160_v12 = vpop.f32.mrf.mxu0  ;;  %v713_v13 = vpop.f32.mrf.mxu1 }
  0xfd   :  { %726 = vmatpush3.xpose.msra.mxu1 %v160_v12 }
  0xfe   :  { %730 = vmatprep.subr.mxu1 %v876_v10  ;;  %v235_v14 = vpop.f32.mrf.mxu1 }
 0x100   :  { %728 = vmatmul.mubr.f32.vlgmr.msra.gmra.mxu1 %v235_v14 }
 0x101   :  { %731 = vmatpush3.xpose.msra.mxu1 %v702_v11  ;;  %732 = vmatprep.mubr.msk.f32.mxu1 %vm877_vm1, %v876_v10 }
 0x102   :  { %740 = vmatprep.subr.mxu1 %v876_v10 }
 0x104   :  { %733 = vmatmul.mubr.f32.vlgmr.msra.gmra.mxu1 %v713_v13 }
 0x105   :  { %742 = vmatprep.mubr.msk.f32.mxu1 %vm877_vm1, %v876_v10 }
 0x106   :  { %v724_v40 = vpop.f32.mrf.mxu0 }
 0x107   :  { %741 = vmatpush3.msra.mxu1 %v724_v40 }
 0x108   :  { %v310_v41 = vpop.f32.mrf.mxu0 }
 0x109   :  { %736 = vmatpush3.msra.mxu0 %v310_v41 }
 0x1c0   :  { %v385_v22 = vpop.f32.mrf.mxu1 }
 0x1c1   :  { %v466_v23 = vsel %vm463_vm2, %v385_v22, -inf }
 0x1c2   :  { %v729_v24 = vpop.f32.mrf.mxu1  ;;  %v469_v25 = vsel %vm468_vm3, %v466_v23, -inf }
 0x1c3   :  { %470 = vmax.xlane.f32.xlu0 %v469_v25 }
 0x1c4   :  { %v455_v26 = vpop.f32.mrf.mxu1 }
 0x1c5   :  { %v467_v27 = vsel %vm463_vm2, %v455_v26, -inf }
 0x1c6   :  { %v734_v28 = vpop.f32.mrf.mxu1  ;;  %v472_v29 = vsel %vm468_vm3, %v467_v27, -inf }
 0x1c7   :  { %473 = vmax.xlane.f32.xlu0 %v472_v29 }
 0x24c   :  { %v471_v30 = vpop.xlane.xlu0 %470 }
 0x24d   :  { %v475_v31 = vsub.f32 %v466_v23, %v471_v30 }
 0x24f   :  { %v477_v32 = vmul.f32 1.442695, %v475_v31 }
 0x250   :  { %v474_v33 = vpop.xlane.xlu0 %473 }
 0x251   :  { %754 = vpow2.f32 %v477_v32  ;;  %v476_v34 = vsub.f32 %v467_v27, %v474_v33 }
 0x253   :  { %v479_v35 = vmul.f32 1.442695, %v476_v34 }
 0x255   :  { %756 = vpow2.f32 %v479_v35 }
 0x25e   :  { %v755_v36 = vpop.eup %754 }
 0x25f   :  { %v481_v37 = vsel %vm468_vm3, %v755_v36, 0.0 }
 0x260   :  { %482 = vadd.xlane.f32.xlu1 %v481_v37 }
 0x262   :  { %v757_v38 = vpop.eup %756 }
 0x263   :  { %v484_v39 = vsel %vm468_vm3, %v757_v38, 0.0 }
 0x264   :  { %485 = vadd.xlane.f32.xlu1 %v484_v39 }
 0x2e9   :  { %v483_v42 = vpop.xlane.xlu1 %482 }
 0x2ea   :  { %758 = vrcp.f32 %v483_v42 }
 0x2ed   :  { %v486_v43 = vpop.xlane.xlu1 %485 }
 0x2ee   :  { %760 = vrcp.f32 %v486_v43 }
 0x2f7   :  { %v759_v44 = vpop.eup %758 }
 0x2f8   :  { %v489_v45 = vmul.f32 %v759_v44, %v755_v36 }
 0x2fa   :  { %738 = vmatmul.mubr.msk.f32.vlgmr.msra.gmra.mxu0 %vm468_vm3, %v489_v45 }
 0x2fb   :  { %v761_v46 = vpop.eup %760 }
 0x2fc   :  { %v490_v47 = vmul.f32 %v761_v46, %v757_v38 }
 0x2fe   :  { %743 = vmatmul.mubr.msk.f32.vlgmr.msra.gmra.mxu1 %vm468_vm3, %v490_v47 }
 0x3ba   :  { %v560_v48 = vpop.f32.mrf.mxu0 }
 0x3bb   :  { %637 = vst [vmem:[#allocation10] sm:$0xff] %v560_v48 }
 0x3bc   :  { %v739_v49 = vpop.f32.mrf.mxu0 }
 0x3be   :  { %v633_v50 = vpop.f32.mrf.mxu1 }
 0x3bf   :  { %638 = vst [vmem:[#allocation10 + $0x8] sm:$0xff] %v633_v50 }
 0x3c0   :  { %v744_v51 = vpop.f32.mrf.mxu1 }
 0x3c1   :  { %853 = shalt.err (!%p850_p10)
}
 0x3c2   :  { %650 = dma.vmem_to_hbm [thread:$0]  %s645_s3, 256, %s954_s4, [#allocation4], %s872_s20, %s872_s20, %s873_s21  }
 0x3c3   :  { %868 = dma.done.wait [#allocation4], 256  }
 0x3c4   :  { %869 = vsyncadd [#allocation4], 4294967040 }
 0x3c5   :  { %654 = vsyncpa [#allocation3], 1 }
 0x3c6   :  { %655 = vsyncpa [#allocation6], 1 }
 0x3c7   :  { %656 = vsyncpa [#allocation9], 1 }
 0x3c8   :  { %657 = vsyncpa [#allocation4], 1 }

</bundles_post_ra>
